<compile_context>
chip_gen: v7x
topology: tpu7x:2x2x1
jax: 0.10.0
libtpu: 0.0.40
codegen_flags: <defaults>
</compile_context>

<pallas_src>
import functools

import jax
import jax.numpy as jnp
import numpy as np
from jax import lax
from jax.experimental import pallas as pl
from jax.experimental.pallas import tpu as pltpu

LN_EPS = 1e-5  # nn.LayerNorm default


def _round_up(a, b):
    return (a + b - 1) // b * b


def _vmem_budget_bytes():
    """Per-generation VMEM budget with headroom for compiler scratch."""
    phys = 64 * 1024 * 1024  # conservative fallback (v7x per-TC VMEM)
    try:
        info = pltpu.get_tpu_info()
        cap = getattr(info, "vmem_capacity_bytes", None)
        if cap:
            phys = int(cap)
    except Exception:
        pass
    # ~50 MiB on v7x (64 MiB physical), ~100 MiB on v5e/v6e (128 MiB physical).
    return min(int(phys * 0.78), 100 * 1024 * 1024)


def _pick_tiles(N, H, F, K, vmem_budget, token_tile, ff_tile):
    """Choose (TN, TF) token / ff-chunk tiles for the given VMEM budget."""
    # FF chunk: prefer full width, else a 256/512/1024-aligned chunk (keeps
    # lane-dense stores and full MXU tiles; 128-multiples on v5e).
    if ff_tile is None:
        TF = F
        for cand in (1024, 512, 256):
            if F > cand and F % cand == 0:
                TF = cand
                break
    else:
        TF = min(ff_tile, F)
        assert F % TF == 0, "ff_tile must divide ff_dim"

    # Token tile: roofline target ~1024 rows so pass 2 is MXU-bound instead of
    # re-streaming expert weights per tiny tile; shrink to fit VMEM.
    tgt = 1024 if token_tile is None else token_tile
    TN = min(_round_up(tgt, 16), _round_up(N, 16))

    def pass2_vmem(tn, tf):
        acts = 2 * tn * H * (4 + 2 + 4)          # x(f32), xn(bf16), out(f32) dbl-buffered
        gates = 2 * tn * K * (4 + 4)             # scores + indices
        wts = 2 * 2 * H * tf * 2                 # W1 + W2 bf16 chunks, dbl-buffered
        small = 2 * (tf * 4 + 2 * H * 4)         # b1, b2, C
        scratch = 2 * tn * 4                     # w/u gate columns
        return acts + gates + wts + small + scratch

    while TN > 16 and pass2_vmem(TN, TF) > vmem_budget:
        TN = _round_up(max(16, TN // 2), 16)

    # Prefer >= 2 token tiles when there is enough work, so both TensorCores
    # of a multi-TC chip (v7x) get a share of the "parallel" token axis.
    if TN >= _round_up(N, 16) and N >= 512:
        TN = _round_up((N + 1) // 2, 16)
    return TN, TF


# --------------------- Pass 1: LayerNorm + depth embed + router ---------------------
def _router_kernel(top_k, x_ref, g_ref, b_ref, de_ref, wg_ref, bg_ref,
                   xn_ref, sc_ref, idx_ref):
    x = x_ref[...].astype(jnp.float32)
    mu = jnp.mean(x, axis=-1, keepdims=True)
    var = jnp.mean((x - mu) ** 2, axis=-1, keepdims=True)
    xn = (x - mu) * lax.rsqrt(var + LN_EPS)
    xn = xn * g_ref[...] + b_ref[...] + de_ref[...]       # depth embed row (zeros if off)
    xn_ref[...] = xn.astype(jnp.bfloat16)

    # Router kept in f32 so top-k selection matches the exact-softmax
    # reference bit-for-bit on near-ties (the matmul is only (TN,H)@(H,E)).
    logits = jnp.dot(xn, wg_ref[...], preferred_element_type=jnp.float32) + bg_ref[...]
    logits = logits - jnp.max(logits, axis=-1, keepdims=True)
    ex = jnp.exp(logits)
    probs = ex * pl.reciprocal(jnp.sum(ex, axis=-1, keepdims=True), approx=True)

    tn, num_experts = probs.shape
    col = lax.broadcasted_iota(jnp.int32, probs.shape, 1)
    kcol = lax.broadcasted_iota(jnp.int32, (tn, top_k), 1)
    sc_out = jnp.zeros((tn, top_k), jnp.float32)
    idx_out = jnp.zeros((tn, top_k), jnp.int32)
    work = probs
    for k in range(top_k):
        best_val = jnp.max(work, axis=-1, keepdims=True)                       # (TN,1)
        best_idx = jnp.min(jnp.where(work == best_val, col, num_experts),
                           axis=-1, keepdims=True)                             # (TN,1)
        sc_out = jnp.where(kcol == k, best_val, sc_out)
        idx_out = jnp.where(kcol == k, best_idx, idx_out)
        work = jnp.where(col == best_idx, -1.0, work)
    # Single full-tile stores (no masked 1-lane partial stores).
    sc_ref[...] = sc_out
    idx_ref[...] = idx_out


# --------------- Pass 2: per-expert FFN, merged top-k, resident accumulator ---------
def _ffn_kernel(top_k, num_experts, aid_ref, pres_ref,
                x_ref, xn_ref, sc_ref, idx_ref,
                w1_ref, b1_ref, w2_ref, b2_ref, c_ref,
                o_ref, w_sc, u_sc):
    e = pl.program_id(1)
    f = pl.program_id(2)
    eid = aid_ref[e]                      # physical expert id (compacted grid)

    @pl.when(jnp.logical_and(e == 0, f == 0))
    def _init():
        o_ref[...] = x_ref[...].astype(jnp.float32)        # residual

    # Presence of this expert at any top-k slot (over real tokens only).
    any_p = jnp.int32(0)
    for k in range(top_k):
        any_p = any_p + pres_ref[k * num_experts + eid]

    # Per-(tile, expert) gate columns + bias terms: computed once at f == 0.
    @pl.when(jnp.logical_and(f == 0, any_p > 0))
    def _gates():
        tn = idx_ref.shape[0]
        idx = idx_ref[...]                # (TN, K) int32
        sc = sc_ref[...]                  # (TN, K) f32
        w = jnp.zeros((tn, 1), jnp.float32)   # routed score weight per token
        u = jnp.zeros((tn, 1), jnp.float32)   # unrouted (bias-leakage) weight per token
        for k in range(top_k):
            m = idx[:, k:k + 1] == eid
            s = sc[:, k:k + 1]
            p_k = (pres_ref[k * num_experts + eid] > 0).astype(jnp.float32)
            w = w + jnp.where(m, s, 0.0)
            u = u + p_k * jnp.where(m, 0.0, s)
        w_sc[...] = w
        u_sc[...] = u
        # Routed tokens get w*b2; unrouted tokens of a present slot get u*FFN(0).
        o_ref[...] = o_ref[...] + w * b2_ref[0] + u * c_ref[0]

    @pl.when(any_p > 0)
    def _compute():
        w1 = w1_ref[0]            # (H, TF)  bf16
        b1 = b1_ref[0]            # (1, TF)  f32
        w2 = w2_ref[0]            # (TF, H)  bf16

        h = jnp.dot(xn_ref[...], w1, preferred_element_type=jnp.float32) + b1
        h = jnp.maximum(h, 0.0)
        # TODO(synk): nn.Dropout is identity in eval mode; training-mode dropout not modelled.
        # Fold the routed gate into the (TN, TF) activations (fused with the bf16 cast).
        wh = (w_sc[...] * h).astype(jnp.bfloat16)
        o_ref[...] = o_ref[...] + jnp.dot(wh, w2, preferred_element_type=jnp.float32)


def mor_block_forward(x, params, top_k, token_tile=None, ff_tile=None):
    """x: (B, S, H) float32. Returns (B, S, H) float32."""
    B, S, H = x.shape
    N = B * S
    E = params["Wg"].shape[1]
    F = params["W1"].shape[2]
    K = top_k

    vmem_budget = _vmem_budget_bytes()
    TN, TF = _pick_tiles(N, H, F, K, vmem_budget, token_tile, ff_tile)
    FC = F // TF
    N_pad = _round_up(N, TN)
    T = N_pad // TN

    x2d = x.reshape(N, H).astype(jnp.float32)
    if N_pad != N:
        x2d = jnp.pad(x2d, ((0, N_pad - N), (0, 0)))

    gamma = params["gamma"].astype(jnp.float32)
    beta = params["beta"].astype(jnp.float32)
    depth_add = params["depth_add"].astype(jnp.float32)
    Wg = params["Wg"].astype(jnp.float32)
    bg = params["bg"].astype(jnp.float32)
    W1 = params["W1"].astype(jnp.bfloat16)   # bf16 expert weights in HBM (MXU native)
    W2 = params["W2"].astype(jnp.bfloat16)
    b1 = params["b1"].astype(jnp.float32)
    b2 = params["b2"].astype(jnp.float32)

    # Precomputed bias-leakage constant FFN_e(0) = relu(b1_e) @ W2_e + b2_e (f32, once).
    C = jnp.einsum("eof,efh->eoh",
                   jnp.maximum(params["b1"].astype(jnp.float32), 0.0),
                   params["W2"].astype(jnp.float32)) + b2          # (E, 1, H)

    cparams = dict(vmem_limit_bytes=vmem_budget)

    # ---- Pass 1: LN + depth embed + router (token tiles in parallel) ----
    xn, scores, idx = pl.pallas_call(
        functools.partial(_router_kernel, K),
        out_shape=(jax.ShapeDtypeStruct((N_pad, H), jnp.bfloat16),
                   jax.ShapeDtypeStruct((N_pad, K), jnp.float32),
                   jax.ShapeDtypeStruct((N_pad, K), jnp.int32)),
        grid_spec=pltpu.PrefetchScalarGridSpec(
            num_scalar_prefetch=0,
            grid=(T,),
            in_specs=[
                pl.BlockSpec((TN, H), lambda t: (t, 0)),   # x tokens
                pl.BlockSpec((1, H), lambda t: (0, 0)),    # gamma
                pl.BlockSpec((1, H), lambda t: (0, 0)),    # beta
                pl.BlockSpec((1, H), lambda t: (0, 0)),    # depth-embedding row
                pl.BlockSpec((H, E), lambda t: (0, 0)),    # router weight
                pl.BlockSpec((1, E), lambda t: (0, 0)),    # router bias
            ],
            out_specs=[
                pl.BlockSpec((TN, H), lambda t: (t, 0)),   # xn (bf16)
                pl.BlockSpec((TN, K), lambda t: (t, 0)),   # top-k scores
                pl.BlockSpec((TN, K), lambda t: (t, 0)),   # top-k indices
            ],
        ),
        compiler_params=pltpu.CompilerParams(
            dimension_semantics=("parallel",), **cparams),
    )(x2d, gamma, beta, depth_add, Wg, bg)

    # Tiny routing bookkeeping over *real* tokens only: per-(k, expert) presence
    # (reproduces `if mask.sum() == 0: continue`) and the active-expert list.
    idx_real = idx[:N]
    presence_ke = jnp.any(
        idx_real[:, :, None] == jnp.arange(E, dtype=jnp.int32)[None, None, :],
        axis=0)                                                    # (K, E) bool
    presence = presence_ke.astype(jnp.int32).reshape(-1)           # (K*E,)

    try:
        # Eager path: compact the expert grid axis so inactive experts' weights
        # are never DMA'd at all.
        pres_np = np.asarray(jax.device_get(presence_ke))
        active_np = np.nonzero(pres_np.any(axis=0))[0].astype(np.int32)
        if active_np.size == 0:           # no routed tokens at all -> pure residual
            return x.astype(jnp.float32)
        active_ids = jnp.asarray(active_np)
        NA = int(active_np.size)
    except Exception:
        # Under jit tracing the grid must stay static: run all experts and rely
        # on the in-kernel presence gate to skip their compute.
        active_ids = jnp.arange(E, dtype=jnp.int32)
        NA = E

    # ---- Pass 2: expert FFNs, accumulated into the residual output ----
    out2d = pl.pallas_call(
        functools.partial(_ffn_kernel, K, E),
        out_shape=jax.ShapeDtypeStruct((N_pad, H), jnp.float32),
        grid_spec=pltpu.PrefetchScalarGridSpec(
            num_scalar_prefetch=2,                                  # active ids + presence -> SMEM
            grid=(T, NA, FC),
            in_specs=[
                pl.BlockSpec((TN, H), lambda t, e, f, a, p: (t, 0)),        # x (residual)
                pl.BlockSpec((TN, H), lambda t, e, f, a, p: (t, 0)),        # xn (bf16)
                pl.BlockSpec((TN, K), lambda t, e, f, a, p: (t, 0)),        # scores
                pl.BlockSpec((TN, K), lambda t, e, f, a, p: (t, 0)),        # indices
                pl.BlockSpec((1, H, TF), lambda t, e, f, a, p: (a[e], 0, f)),  # W1 chunk
                pl.BlockSpec((1, 1, TF), lambda t, e, f, a, p: (a[e], 0, f)),  # b1 chunk
                pl.BlockSpec((1, TF, H), lambda t, e, f, a, p: (a[e], f, 0)),  # W2 chunk
                pl.BlockSpec((1, 1, H), lambda t, e, f, a, p: (a[e], 0, 0)),   # b2
                pl.BlockSpec((1, 1, H), lambda t, e, f, a, p: (a[e], 0, 0)),   # C = FFN(0)
            ],
            out_specs=pl.BlockSpec((TN, H), lambda t, e, f, a, p: (t, 0)),
            scratch_shapes=[pltpu.VMEM((TN, 1), jnp.float32),    # w gate column
                            pltpu.VMEM((TN, 1), jnp.float32)],   # u gate column
        ),
        compiler_params=pltpu.CompilerParams(
            dimension_semantics=("parallel", "arbitrary", "arbitrary"), **cparams),
    )(active_ids, presence, x2d, xn, scores, idx, W1, b1, W2, b2, C)

    return out2d[:N].reshape(B, S, H)


def mor_block_reference(x, params, top_k):
    """Pure-JAX f32 reference mirroring the PyTorch forward."""
    B, S, H = x.shape
    xf = x.reshape(-1, H).astype(jnp.float32)
    mu = jnp.mean(xf, axis=-1, keepdims=True)
    var = jnp.mean((xf - mu) ** 2, axis=-1, keepdims=True)
    xn = (xf - mu) / jnp.sqrt(var + LN_EPS) * params["gamma"] + params["beta"]
    xn = xn + params["depth_add"]

    logits = xn @ params["Wg"] + params["bg"]
    probs = jax.nn.softmax(logits, axis=-1)
    scores, idxs = lax.top_k(probs, top_k)

    E = params["Wg"].shape[1]
    out = jnp.zeros_like(xn)
    for k in range(top_k):
        sc = scores[:, k:k + 1]
        ind = idxs[:, k:k + 1]
        for i in range(E):
            mask = (ind == i).astype(jnp.float32)
            gate = (jnp.sum(mask) > 0).astype(jnp.float32)
            xm = xn * mask
            h = jnp.maximum(xm @ params["W1"][i] + params["b1"][i, 0], 0.0)
            eo = h @ params["W2"][i] + params["b2"][i, 0]
            out = out + gate * (sc * eo)
    return (xf + out).reshape(B, S, H)


def make_params(key, hidden_dim, ff_dim, num_experts, use_depth_embed=False,
                max_depth=4, depth=0):
    ks = jax.random.split(key, 8)
    params = {
        "gamma": jnp.ones((1, hidden_dim), jnp.float32),
        "beta": jnp.zeros((1, hidden_dim), jnp.float32),
        "Wg": 0.05 * jax.random.normal(ks[0], (hidden_dim, num_experts), jnp.float32),
        "bg": 0.05 * jax.random.normal(ks[1], (1, num_experts), jnp.float32),
        "W1": 0.05 * jax.random.normal(ks[2], (num_experts, hidden_dim, ff_dim), jnp.float32),
        "b1": 0.05 * jax.random.normal(ks[3], (num_experts, 1, ff_dim), jnp.float32),
        "W2": 0.05 * jax.random.normal(ks[4], (num_experts, ff_dim, hidden_dim), jnp.float32),
        "b2": 0.05 * jax.random.normal(ks[5], (num_experts, 1, hidden_dim), jnp.float32),
    }
    if use_depth_embed:
        emb = 0.05 * jax.random.normal(ks[6], (max_depth, hidden_dim), jnp.float32)
        safe_depth = min(depth, max_depth - 1)
        params["depth_add"] = emb[safe_depth][None, :]
    else:
        params["depth_add"] = jnp.zeros((1, hidden_dim), jnp.float32)
    return params


if __name__ == "__main__":
    key = jax.random.PRNGKey(0)

    # Config 1: exercises token tiling (4 tiles) and FFN hidden-dim chunking (2 chunks).
    B, S, H, F, E, TOP_K = 2, 16, 32, 256, 4, 2
    kx, kp = jax.random.split(key)
    x = jax.random.normal(kx, (B, S, H), jnp.float32)
    params = make_params(kp, H, F, E, use_depth_embed=True, max_depth=4, depth=2)

    ref = mor_block_reference(x, params, TOP_K)
    out = jax.block_until_ready(mor_block_forward(x, params, TOP_K, token_tile=16, ff_tile=128))
    np.testing.assert_allclose(np.asarray(out), np.asarray(ref), rtol=2e-2, atol=2e-2)

    # Default tiling path (auto TN / TF from the per-generation VMEM budget).
    out2 = jax.block_until_ready(mor_block_forward(x, params, TOP_K))
    np.testing.assert_allclose(np.asarray(out2), np.asarray(ref), rtol=2e-2, atol=2e-2)

    # Config 2: more experts than routed tokens -> exercises the active-expert
    # grid compaction (weights of unrouted experts are never DMA'd).
    B2, S2, H2, F2, E2, K2 = 1, 8, 32, 128, 16, 1
    kx2, kp2 = jax.random.split(jax.random.PRNGKey(1))
    x2 = jax.random.normal(kx2, (B2, S2, H2), jnp.float32)
    params2 = make_params(kp2, H2, F2, E2)
    ref2 = mor_block_reference(x2, params2, K2)
    out3 = jax.block_until_ready(mor_block_forward(x2, params2, K2))
    np.testing.assert_allclose(np.asarray(out3), np.asarray(ref2), rtol=2e-2, atol=2e-2)

    print("KERNEL_OK")
</pallas_src>

<mosaic_0001>
module attributes {stable_mosaic.version = 11 : i64} {
  func.func @_router_kernel(%arg0: i32, %arg1: memref<16x32xf32, #tpu.memory_space<vmem>>, %arg2: memref<1x32xf32, #tpu.memory_space<vmem>>, %arg3: memref<1x32xf32, #tpu.memory_space<vmem>>, %arg4: memref<1x32xf32, #tpu.memory_space<vmem>>, %arg5: memref<32x4xf32, #tpu.memory_space<vmem>>, %arg6: memref<1x4xf32, #tpu.memory_space<vmem>>, %arg7: memref<16x32xbf16, #tpu.memory_space<vmem>>, %arg8: memref<16x2xf32, #tpu.memory_space<vmem>>, %arg9: memref<16x2xi32, #tpu.memory_space<vmem>>) attributes {dimension_semantics = [#tpu.dimension_semantics<parallel>], iteration_bounds = array<i64: 2>, scalar_prefetch = 0 : i64, scratch_operands = 0 : i64, tpu.core_type = #tpu.core_type<tc>, window_params = [{transform_indices = @transform_0, window_bounds = array<i64: 16, 32>}, {pipeline_mode = #tpu.pipeline_mode<synchronous>, transform_indices = @transform_1, window_bounds = array<i64: 1, 32>}, {pipeline_mode = #tpu.pipeline_mode<synchronous>, transform_indices = @transform_2, window_bounds = array<i64: 1, 32>}, {pipeline_mode = #tpu.pipeline_mode<synchronous>, transform_indices = @transform_3, window_bounds = array<i64: 1, 32>}, {pipeline_mode = #tpu.pipeline_mode<synchronous>, transform_indices = @transform_4, window_bounds = array<i64: 32, 4>}, {pipeline_mode = #tpu.pipeline_mode<synchronous>, transform_indices = @transform_5, window_bounds = array<i64: 1, 4>}, {transform_indices = @transform_6, window_bounds = array<i64: 16, 32>}, {transform_indices = @transform_7, window_bounds = array<i64: 16, 2>}, {transform_indices = @transform_8, window_bounds = array<i64: 16, 2>}]} {
    %c0 = arith.constant 0 : index
    %c0_0 = arith.constant 0 : index
    %0 = vector.load %arg1[%c0, %c0_0] : memref<16x32xf32, #tpu.memory_space<vmem>>, vector<16x32xf32>
    %cst = arith.constant dense<0.000000e+00> : vector<16xf32>
    %1 = vector.multi_reduction <add>, %0, %cst [1] : vector<16x32xf32> to vector<16xf32>
    %2 = vector.shape_cast %1 : vector<16xf32> to vector<16x1xf32>
    %cst_1 = arith.constant 3.200000e+01 : f32
    %3 = vector.broadcast %cst_1 : f32 to vector<16x1xf32>
    %4 = arith.divf %2, %3 : vector<16x1xf32>
    %5 = vector.broadcast %4 : vector<16x1xf32> to vector<16x32xf32>
    %6 = arith.subf %0, %5 : vector<16x32xf32>
    %7 = arith.mulf %6, %6 : vector<16x32xf32>
    %cst_2 = arith.constant dense<0.000000e+00> : vector<16xf32>
    %8 = vector.multi_reduction <add>, %7, %cst_2 [1] : vector<16x32xf32> to vector<16xf32>
    %9 = vector.shape_cast %8 : vector<16xf32> to vector<16x1xf32>
    %cst_3 = arith.constant 3.200000e+01 : f32
    %10 = vector.broadcast %cst_3 : f32 to vector<16x1xf32>
    %11 = arith.divf %9, %10 : vector<16x1xf32>
    %12 = vector.broadcast %4 : vector<16x1xf32> to vector<16x32xf32>
    %13 = arith.subf %0, %12 : vector<16x32xf32>
    %cst_4 = arith.constant 9.99999974E-6 : f32
    %14 = vector.broadcast %cst_4 : f32 to vector<16x1xf32>
    %15 = arith.addf %11, %14 : vector<16x1xf32>
    %16 = math.rsqrt %15 : vector<16x1xf32>
    %17 = vector.broadcast %16 : vector<16x1xf32> to vector<16x32xf32>
    %18 = arith.mulf %13, %17 : vector<16x32xf32>
    %c0_5 = arith.constant 0 : index
    %c0_6 = arith.constant 0 : index
    %19 = vector.load %arg2[%c0_5, %c0_6] : memref<1x32xf32, #tpu.memory_space<vmem>>, vector<1x32xf32>
    %20 = vector.broadcast %19 : vector<1x32xf32> to vector<16x32xf32>
    %21 = arith.mulf %18, %20 : vector<16x32xf32>
    %c0_7 = arith.constant 0 : index
    %c0_8 = arith.constant 0 : index
    %22 = vector.load %arg3[%c0_7, %c0_8] : memref<1x32xf32, #tpu.memory_space<vmem>>, vector<1x32xf32>
    %23 = vector.broadcast %22 : vector<1x32xf32> to vector<16x32xf32>
    %24 = arith.addf %21, %23 : vector<16x32xf32>
    %c0_9 = arith.constant 0 : index
    %c0_10 = arith.constant 0 : index
    %25 = vector.load %arg4[%c0_9, %c0_10] : memref<1x32xf32, #tpu.memory_space<vmem>>, vector<1x32xf32>
    %26 = vector.broadcast %25 : vector<1x32xf32> to vector<16x32xf32>
    %27 = arith.addf %24, %26 : vector<16x32xf32>
    %28 = arith.truncf %27 : vector<16x32xf32> to vector<16x32xbf16>
    %c0_11 = arith.constant 0 : index
    %c0_12 = arith.constant 0 : index
    %29 = vector.load %arg7[%c0_11, %c0_12] : memref<16x32xbf16, #tpu.memory_space<vmem>>, vector<16x32xbf16>
    tpu.vector_store %arg7[%c0_11, %c0_12], %28 {strides = array<i32>} : memref<16x32xbf16, #tpu.memory_space<vmem>>, vector<16x32xbf16>,
    %c0_13 = arith.constant 0 : index
    %c0_14 = arith.constant 0 : index
    %30 = vector.load %arg5[%c0_13, %c0_14] : memref<32x4xf32, #tpu.memory_space<vmem>>, vector<32x4xf32>
    %cst_15 = arith.constant dense<0.000000e+00> : vector<16x4xf32>
    %31 = tpu.matmul %27, %30, %cst_15 {dimension_numbers = #tpu.dot_dimension_numbers<[1], [0], [0], [1], [0, 0, 1, 1], [], []>} : vector<16x32xf32>, vector<32x4xf32>, vector<16x4xf32> -> vector<16x4xf32>
    %c0_16 = arith.constant 0 : index
    %c0_17 = arith.constant 0 : index
    %32 = vector.load %arg6[%c0_16, %c0_17] : memref<1x4xf32, #tpu.memory_space<vmem>>, vector<1x4xf32>
    %33 = vector.broadcast %32 : vector<1x4xf32> to vector<16x4xf32>
    %34 = arith.addf %31, %33 : vector<16x4xf32>
    %cst_18 = arith.constant dense<0xFF800000> : vector<16xf32>
    %35 = vector.multi_reduction <maximumf>, %34, %cst_18 [1] : vector<16x4xf32> to vector<16xf32>
    %36 = vector.shape_cast %35 : vector<16xf32> to vector<16x1xf32>
    %37 = vector.broadcast %36 : vector<16x1xf32> to vector<16x4xf32>
    %38 = arith.subf %34, %37 : vector<16x4xf32>
    %39 = math.exp %38 : vector<16x4xf32>
    %cst_19 = arith.constant dense<0.000000e+00> : vector<16xf32>
    %40 = vector.multi_reduction <add>, %39, %cst_19 [1] : vector<16x4xf32> to vector<16xf32>
    %41 = vector.shape_cast %40 : vector<16xf32> to vector<16x1xf32>
    %42 = tpu.reciprocal %41 {approx = true} : vector<16x1xf32> -> vector<16x1xf32>
    %43 = vector.broadcast %42 : vector<16x1xf32> to vector<16x4xf32>
    %44 = arith.mulf %39, %43 : vector<16x4xf32>
    %45 = tpu.iota {dimensions = array<i32: 1>} : vector<16x4xi32>
    %46 = tpu.iota {dimensions = array<i32: 1>} : vector<16x2xi32>
    %cst_20 = arith.constant 0.000000e+00 : f32
    %47 = vector.broadcast %cst_20 : f32 to vector<16x2xf32>
    %c0_i32 = arith.constant 0 : i32
    %48 = vector.broadcast %c0_i32 : i32 to vector<16x2xi32>
    %cst_21 = arith.constant dense<0xFF800000> : vector<16xf32>
    %49 = vector.multi_reduction <maximumf>, %44, %cst_21 [1] : vector<16x4xf32> to vector<16xf32>
    %50 = vector.shape_cast %49 : vector<16xf32> to vector<16x1xf32>
    %51 = vector.broadcast %50 : vector<16x1xf32> to vector<16x4xf32>
    %52 = arith.cmpf oeq, %44, %51 : vector<16x4xf32>
    %c4_i32 = arith.constant 4 : i32
    %53 = vector.broadcast %c4_i32 : i32 to vector<16x4xi32>
    %54 = arith.select %52, %45, %53 : vector<16x4xi1>, vector<16x4xi32>
    %cst_22 = arith.constant dense<2147483647> : vector<16xi32>
    %55 = vector.multi_reduction <minsi>, %54, %cst_22 [1] : vector<16x4xi32> to vector<16xi32>
    %56 = vector.shape_cast %55 : vector<16xi32> to vector<16x1xi32>
    %c0_i32_23 = arith.constant 0 : i32
    %57 = vector.broadcast %c0_i32_23 : i32 to vector<16x2xi32>
    %58 = arith.cmpi eq, %46, %57 : vector<16x2xi32>
    %59 = vector.shape_cast %50 : vector<16x1xf32> to vector<16x1xf32>
    %60 = vector.broadcast %59 : vector<16x1xf32> to vector<16x2xf32>
    %61 = arith.select %58, %60, %47 : vector<16x2xi1>, vector<16x2xf32>
    %c0_i32_24 = arith.constant 0 : i32
    %62 = vector.broadcast %c0_i32_24 : i32 to vector<16x2xi32>
    %63 = arith.cmpi eq, %46, %62 : vector<16x2xi32>
    %64 = vector.shape_cast %56 : vector<16x1xi32> to vector<16x1xi32>
    %65 = vector.broadcast %64 : vector<16x1xi32> to vector<16x2xi32>
    %66 = arith.select %63, %65, %48 : vector<16x2xi1>, vector<16x2xi32>
    %67 = vector.broadcast %56 : vector<16x1xi32> to vector<16x4xi32>
    %68 = arith.cmpi eq, %45, %67 : vector<16x4xi32>
    %cst_25 = arith.constant -1.000000e+00 : f32
    %69 = vector.broadcast %cst_25 : f32 to vector<16x4xf32>
    %70 = arith.select %68, %69, %44 : vector<16x4xi1>, vector<16x4xf32>
    %cst_26 = arith.constant dense<0xFF800000> : vector<16xf32>
    %71 = vector.multi_reduction <maximumf>, %70, %cst_26 [1] : vector<16x4xf32> to vector<16xf32>
    %72 = vector.shape_cast %71 : vector<16xf32> to vector<16x1xf32>
    %73 = vector.broadcast %72 : vector<16x1xf32> to vector<16x4xf32>
    %74 = arith.cmpf oeq, %70, %73 : vector<16x4xf32>
    %c4_i32_27 = arith.constant 4 : i32
    %75 = vector.broadcast %c4_i32_27 : i32 to vector<16x4xi32>
    %76 = arith.select %74, %45, %75 : vector<16x4xi1>, vector<16x4xi32>
    %cst_28 = arith.constant dense<2147483647> : vector<16xi32>
    %77 = vector.multi_reduction <minsi>, %76, %cst_28 [1] : vector<16x4xi32> to vector<16xi32>
    %78 = vector.shape_cast %77 : vector<16xi32> to vector<16x1xi32>
    %c1_i32 = arith.constant 1 : i32
    %79 = vector.broadcast %c1_i32 : i32 to vector<16x2xi32>
    %80 = arith.cmpi eq, %46, %79 : vector<16x2xi32>
    %81 = vector.shape_cast %72 : vector<16x1xf32> to vector<16x1xf32>
    %82 = vector.broadcast %81 : vector<16x1xf32> to vector<16x2xf32>
    %83 = arith.select %80, %82, %61 : vector<16x2xi1>, vector<16x2xf32>
    %c1_i32_29 = arith.constant 1 : i32
    %84 = vector.broadcast %c1_i32_29 : i32 to vector<16x2xi32>
    %85 = arith.cmpi eq, %46, %84 : vector<16x2xi32>
    %86 = vector.shape_cast %78 : vector<16x1xi32> to vector<16x1xi32>
    %87 = vector.broadcast %86 : vector<16x1xi32> to vector<16x2xi32>
    %88 = arith.select %85, %87, %66 : vector<16x2xi1>, vector<16x2xi32>
    %c0_30 = arith.constant 0 : index
    %c0_31 = arith.constant 0 : index
    %89 = vector.load %arg8[%c0_30, %c0_31] : memref<16x2xf32, #tpu.memory_space<vmem>>, vector<16x2xf32>
    tpu.vector_store %arg8[%c0_30, %c0_31], %83 {strides = array<i32>} : memref<16x2xf32, #tpu.memory_space<vmem>>, vector<16x2xf32>,
    %c0_32 = arith.constant 0 : index
    %c0_33 = arith.constant 0 : index
    %90 = vector.load %arg9[%c0_32, %c0_33] : memref<16x2xi32, #tpu.memory_space<vmem>>, vector<16x2xi32>
    tpu.vector_store %arg9[%c0_32, %c0_33], %88 {strides = array<i32>} : memref<16x2xi32, #tpu.memory_space<vmem>>, vector<16x2xi32>,
    return
  }
  func.func @transform_0(%arg0: i32) -> (i32, i32) {
    %c0_i32 = arith.constant 0 : i32
    %c0_i32_0 = arith.constant 0 : i32
    return %arg0, %c0_i32 : i32, i32
  }
  func.func @transform_1(%arg0: i32) -> (i32, i32) {
    %c0_i32 = arith.constant 0 : i32
    %c0_i32_0 = arith.constant 0 : i32
    %c0_i32_1 = arith.constant 0 : i32
    return %c0_i32, %c0_i32_0 : i32, i32
  }
  func.func @transform_2(%arg0: i32) -> (i32, i32) {
    %c0_i32 = arith.constant 0 : i32
    %c0_i32_0 = arith.constant 0 : i32
    %c0_i32_1 = arith.constant 0 : i32
    return %c0_i32, %c0_i32_0 : i32, i32
  }
  func.func @transform_3(%arg0: i32) -> (i32, i32) {
    %c0_i32 = arith.constant 0 : i32
    %c0_i32_0 = arith.constant 0 : i32
    %c0_i32_1 = arith.constant 0 : i32
    return %c0_i32, %c0_i32_0 : i32, i32
  }
  func.func @transform_4(%arg0: i32) -> (i32, i32) {
    %c0_i32 = arith.constant 0 : i32
    %c0_i32_0 = arith.constant 0 : i32
    %c0_i32_1 = arith.constant 0 : i32
    return %c0_i32, %c0_i32_0 : i32, i32
  }
  func.func @transform_5(%arg0: i32) -> (i32, i32) {
    %c0_i32 = arith.constant 0 : i32
    %c0_i32_0 = arith.constant 0 : i32
    %c0_i32_1 = arith.constant 0 : i32
    return %c0_i32, %c0_i32_0 : i32, i32
  }
  func.func @transform_6(%arg0: i32) -> (i32, i32) {
    %c0_i32 = arith.constant 0 : i32
    %c0_i32_0 = arith.constant 0 : i32
    return %arg0, %c0_i32 : i32, i32
  }
  func.func @transform_7(%arg0: i32) -> (i32, i32) {
    %c0_i32 = arith.constant 0 : i32
    %c0_i32_0 = arith.constant 0 : i32
    return %arg0, %c0_i32 : i32, i32
  }
  func.func @transform_8(%arg0: i32) -> (i32, i32) {
    %c0_i32 = arith.constant 0 : i32
    %c0_i32_0 = arith.constant 0 : i32
    return %arg0, %c0_i32 : i32, i32
  }
}

</mosaic_0001>

<bundles_post_ra>
// kernel: tpu_custom_call.1
= control target key start
LH: loop header
LB: loop body
LE: loop exit
PB: predicated region body
PF: predicated region fallthrough
CT: control target
= control target key end

     0   :  { %14 = vsyncpa [#allocation3], 0  ;;  %s1181_s0 = inlined_call_operand.vmem [shape: f32[32,32], index: 0, kind: input, shape index: {}]   ;;  %s1182_s1 = inlined_call_operand.vmem [shape: f32[1,32], index: 1, kind: input, shape index: {}]   ;;  %s1183_s2 = inlined_call_operand.vmem [shape: f32[1,32], index: 2, kind: input, shape index: {}]   ;;  %s1184_s3 = inlined_call_operand.vmem [shape: f32[1,32], index: 3, kind: input, shape index: {}]   ;;  %s1185_s4 = inlined_call_operand.vmem [shape: f32[32,4], index: 4, kind: input, shape index: {}]   ;;  %s1186_s5 = inlined_call_operand.vmem [shape: f32[1,4], index: 5, kind: input, shape index: {}]   ;;  %s1187_s6 = inlined_call_operand.hbm [shape: bf16[32,32], index: 6, kind: output, shape index: {0}]   ;;  %s1188_s7 = inlined_call_operand.vmem [shape: f32[32,2], index: 7, kind: output, shape index: {1}]   ;;  %s1189_s8 = inlined_call_operand.vmem [shape: s32[32,2], index: 8, kind: output, shape index: {2}]  }
   0x1   :  { %16 = vsyncpa [#allocation3 + $0x1], 0  ;;  %s979_s27 = smov 0   ;;  %s981_s28 = smov 0  }
   0x2   :  { %s983_s29 = smov 0   ;;  %s985_s30 = smov 0  }
   0x3 LB: > { %s1000_s9 = sadd.s32 4294967295, %s929_s30   ;;  %s762_s10 = sadd.s32 4294967294, %s929_s30   ;;  %s929_s30 = sphi %s985_s30, %s1195_s30   ;;  %s925_s29 = sphi %s983_s29, %s1194_s29   ;;  %s921_s28 = sphi %s981_s28, %s1193_s28   ;;  %s917_s27 = sphi %s979_s27, %s1192_s27  }
   0x4   : > { %s1004_s11 = sadd.s32 1, %s929_s30   ;;  %s160_s12 = sadd.s32 1, %s925_s29 }
   0x5   : > { %s157_s13 = ssub.s32 %s929_s30, %s1004_s11  ;;  %p170_p0 = scmp.ne.s32.totalorder %s925_s29, %s921_s28 }
   0x6   : > { %p158_p1 = scmp.eq.s32.totalorder %s157_s13, 0  ;;  %p171_p2 = scmp.eq.s32.totalorder %s1000_s9, 1 }
   0x7   : > { %p176_p3 = scmp.ne.s32.totalorder %s921_s28, %s917_s27  ;;  %p177_p4 = scmp.eq.s32.totalorder %s762_s10, 1 }
   0x8   : > { %s1015_s14 = scalar_select %p158_p1, %s925_s29, %s160_s12  }
   0x9   : > { %p1017_p5 = por %p171_p2, %p170_p0  ;;  %p1021_p6 = por %p177_p4, %p176_p3 }
   0xa   : > { %p765_p7 = scmp.ge.s32.totalorder %s929_s30, 1  ;;  %p271_p8 = scmp.lt.s32.totalorder %s929_s30, 3 }
   0xc   : > { %p272_p9 = pnand %p765_p7, %p271_p8 }
   0xd   : > { %s767_s17 = sshll.u32 (!%p272_p9), %s1000_s9, 1  ;;  %vm336_vm0 = vcmask (!%p272_p9), 261120   ;;  %v402_v14 = vld [vmem:[%s1185_s4] sm:$0xff] (!%p272_p9)  ;;  %v403_v15 = vld [vmem:[%s1185_s4 + $0x8] sm:$0xff] (!%p272_p9)  ;;  %v404_v16 = vld [vmem:[%s1185_s4 + $0x10] sm:$0xff] (!%p272_p9)  ;;  %s298_s20 = sand.u32 (!%p272_p9), 1, %s921_s28  }
   0xe   : > { %275 = sbr.rel (%p272_p9) target bundleno = 1757 (0x6dd), region = 44  ;;  %p316_p10 = scmp.lt.s32.totalorder (!%p272_p9), %s767_s17, 3  ;;  %v806_v17 = vpack.c.bf16 (!%p272_p9), %v403_v15, %v402_v14  ;;  %v405_v18 = vld [vmem:[%s1185_s4 + $0x18] sm:$0xff] (!%p272_p9)  ;;  %v773_v27 = vld [vmem:[%s1182_s1] ss:$0 sm:$0xff] (!%p272_p9)  ;;  %vm399_vm1 = vcmask (!%p272_p9), 257024  }
   0xf   : > { %v810_v19 = vpack.c.bf16 (!%p272_p9), %v405_v18, %v404_v16  ;;  %v774_v29 = vld [vmem:[%s1183_s2] ss:$0 sm:$0xff] (!%p272_p9)  ;;  %s766_s25 = sshll.u32 (!%p272_p9), %s298_s20, 3  ;;  %vm494_vm2 = vcmask (!%p272_p9), 31744   ;;  %vm613_vm11 = vcmask (!%p272_p9), 15360   ;;  %s1124_s10 = scalar_lea.sflag (!%p272_p9), [#allocation3], %s298_s20 }
  0x10   : > { %807 = vmatprep.subr.bf16.mxu0 (!%p272_p9), %v806_v17  ;;  %v775_v32 = vld [vmem:[%s1184_s3] ss:$0 sm:$0xff] (!%p272_p9)  ;;  %s1063_s26 = scalar_lea.vmem (!%p272_p9), [#allocation2], %s766_s25 }
  0x11   : > { %809 = vmatpush3.bf16.msra.mxu0 (!%p272_p9), %v806_v17  ;;  %v778_v41 = vld [vmem:[%s1186_s5] ss:$0 sm:$0xff] (!%p272_p9)  ;;  %s642_s22 = sshll.u32 (!%p272_p9), %s1063_s26, 4  ;;  %s1120_s22 = int_to_ptr.vmem [resolvable:$true] %s642_s22 }
  0x12   : > { %811 = vmatprep.subr.bf16.mxu0 (!%p272_p9), %v810_v19  ;;  %s867_s12 = scalar_lea.vmem (!%p272_p9), %s1120_s22, 128 }
  0x13   : > { %p868_p11 = scmp.ne.s32.totalorder (!%p272_p9), %s1120_s22, %s867_s12 }
  0x15   : > { %s1197_s17 = smov (!%p316_p10, %s767_s17), 3  ;;  %813 = vmatpush3.bf16.msra.mxu0 %v810_v19  ;;  %p869_p12 = pnand %p868_p11, %p1017_p5 }
  0x16   : > { %s1028_s18 = sshll.u32 %s1197_s17, 3 }
  0x17   : > { %s319_s21 = scalar_lea.vmem %s1181_s0, %s1028_s18  ;;  %s326_s19 = scalar_lea.vmem %s1188_s7, %s1028_s18 }
  0x18   : > { %v334_v0 = vld [vmem:[%s319_s21] sm:$0xff]  ;;  %v335_v1 = vld [vmem:[%s319_s21 + $0x8] sm:$0xff]  ;;  %s788_s21 = sshll.u32 %s1000_s9, 7  ;;  %p870_p13 = pneg %p869_p12 }
  0x19   : > { %v337_v2 = vsel %vm336_vm0, %v334_v0, 0.0  ;;  %v340_v3 = vsel %vm336_vm0, %v335_v1, 0.0  ;;  %s1118_s25 = scalar_lea.hbm %s1187_s6, %s788_s21  ;;  %s931_s9 = smov [#allocation2]  }
  0x1a   : > { %338 = vadd.xlane.f32.xlu0 %v337_v2  ;;  %v517_v2 = vlaneseq }
  0x1e   : > { %341 = vadd.xlane.f32.xlu0 %v340_v3  ;;  %v1077_v3 = vand.u32 127, %v517_v2 }
  0x20   : > { %vm559_vm9 = vcmp.eq.s32.totalorder %v1077_v3, 0  ;;  %vm608_vm10 = vcmp.eq.s32.totalorder %v1077_v3, 1 }
  0xa7   : > { %v339_v4 = vpop.xlane.xlu0 %338 }
  0xa8   : > { %v344_v5 = vmul.f32 0.03125, %v339_v4 }
  0xaa   : > { %v346_v6 = vsub.f32 %v334_v0, %v344_v5 }
  0xab   : > { %v342_v7 = vpop.xlane.xlu0 %341 }
  0xac   : > { %v345_v8 = vmul.f32 0.03125, %v342_v7  ;;  %v348_v9 = vmul.f32 %v346_v6, %v346_v6 }
  0xae   : > { %v347_v10 = vsub.f32 %v335_v1, %v345_v8  ;;  %v350_v11 = vsel %vm336_vm0, %v348_v9, 0.0 }
  0xaf   : > { %351 = vadd.xlane.f32.xlu1 %v350_v11 }
  0xb0   : > { %v349_v12 = vmul.f32 %v347_v10, %v347_v10 }
  0xb2   : > { %v353_v13 = vsel %vm336_vm0, %v349_v12, 0.0 }
  0xb3   : > { %354 = vadd.xlane.f32.xlu1 %v353_v13 }
 0x13c   : > { %v352_v20 = vpop.xlane.xlu1 %351 }
 0x13d   : > { %v356_v21 = vmul.f32 0.03125, %v352_v20 }
 0x13f   : > { %v358_v22 = vadd.f32 1e-05, %v356_v21 }
 0x140   : > { %v355_v23 = vpop.xlane.xlu1 %354 }
 0x141   : > { %855 = vrsqrt.f32 %v358_v22  ;;  %v357_v24 = vmul.f32 0.03125, %v355_v23 }
 0x143   : > { %v359_v25 = vadd.f32 1e-05, %v357_v24 }
 0x145   : > { %857 = vrsqrt.f32 %v359_v25 }
 0x14b   : > { %v856_v26 = vpop.eup %855 }
 0x14c   : > { %v362_v28 = vmul.f32 %v856_v26, %v346_v6 }
 0x14e   : > { %v371_v30 = vmul.f32 %v773_v27, %v362_v28 }
 0x14f   : > { %v858_v31 = vpop.eup %857 }
 0x150   : > { %v363_v33 = vmul.f32 %v858_v31, %v347_v10  ;;  %v380_v34 = vadd.f32 %v774_v29, %v371_v30 }
 0x152   : > { %v372_v35 = vmul.f32 %v773_v27, %v363_v33  ;;  %v389_v36 = vadd.f32 %v775_v32, %v380_v34 }
 0x154   : > { %v381_v37 = vadd.f32 %v774_v29, %v372_v35  ;;  %v786_v38 = vpack.c.bf16 %v389_v36, %v389_v36  ;;  %803 = vmatprep.mubr.msk.f32.mxu0 %vm336_vm0, %v389_v36 }
 0x156   : > { %v390_v39 = vadd.f32 %v775_v32, %v381_v37  ;;  %400 = vst.msk [vmem:[%s1063_s26] sm:$0xf] %vm399_vm1, %v786_v38 }
 0x158   : > { %v787_v40 = vpack.c.bf16 %v390_v39, %v390_v39  ;;  %804 = vmatmul.mubr.msk.f32.vlgmr.msra.gmra.mrb[0].mxu0 %vm336_vm0, %v390_v39 }
 0x15a   : > { %401 = vst.msk [vmem:[%s1063_s26 + $0x4] sm:$0xf] %vm399_vm1, %v787_v40  ;;  %s871_s26 = sshll.u32 %s931_s9, 4  ;;  %s872_s26 = int_to_ptr.vmem [resolvable:$false] %s871_s26 }
 0x15b   : > { %s873_s13 = scalar_lea.vmem %s872_s26, 256  ;;  %p874_p0 = scmp.lt.s32.totalorder %s1120_s22, %s872_s26 }
 0x15c   : > { %p875_p1 = scmp.lt.s32.totalorder %s873_s13, %s867_s12 }
 0x15e   : > { %p876_p2 = por %p875_p1, %p874_p0 }
 0x160   : > { %p877_p3 = pnand %p876_p2, %p870_p13 }
 0x22b   : > { %v805_v42 = vpop.f32.mrb[0].mxu0 }
 0x22c   : > { %v491_v43 = vadd.f32 %v805_v42, %v778_v41  ;;  %v485_v44 = vpop.f32.mrb[1].mxu0 }
 0x22d   : > { %v486_v45 = vadd.f32 %v778_v41, %v485_v44 }
 0x22e   : > { %v498_v46 = vsel %vm494_vm2, %v491_v43, -inf }
 0x22f   : > { %499 = vmax.xlane.f32.xlu1 %v498_v46  ;;  %v495_v47 = vsel %vm494_vm2, %v486_v45, -inf }
 0x230   : > { %496 = vmax.xlane.f32.xlu0 %v495_v47 }
 0x2bc   : > { %v500_v48 = vpop.xlane.xlu1 %499 }
 0x2bd   : > { %v502_v49 = vsub.f32 %v491_v43, %v500_v48  ;;  %v497_v50 = vpop.xlane.xlu0 %496 }
 0x2be   : > { %v501_v51 = vsub.f32 %v486_v45, %v497_v50 }
 0x2bf   : > { %v505_v52 = vmul.f32 1.442695, %v502_v49 }
 0x2c0   : > { %v503_v53 = vmul.f32 1.442695, %v501_v51 }
 0x2c1   : > { %859 = vpow2.f32 %v505_v52 }
 0x2c2   : > { %861 = vpow2.f32 %v503_v53 }
 0x2cb   : > { %v860_v54 = vpop.eup %859 }
 0x2cc   : > { %v862_v55 = vpop.eup %861  ;;  %v510_v56 = vsel %vm494_vm2, %v860_v54, 0.0 }
 0x2cd   : > { %511 = vadd.xlane.f32.xlu1 %v510_v56  ;;  %v507_v57 = vsel %vm494_vm2, %v862_v55, 0.0 }
 0x2ce   : > { %508 = vadd.xlane.f32.xlu0 %v507_v57 }
 0x35a   : > { %v512_v58 = vpop.xlane.xlu1 %511 }
 0x35b   : > { %863 = vrcp.f32 %v512_v58  ;;  %v509_v59 = vpop.xlane.xlu0 %508 }
 0x35c   : > { %865 = vrcp.f32 %v509_v59 }
 0x365   : > { %v864_v60 = vpop.eup %863 }
 0x366   : > { %v866_v61 = vpop.eup %865  ;;  %v516_v62 = vmul.f32 %v864_v60, %v860_v54 }
 0x367   : > { %v515_v63 = vmul.f32 %v866_v61, %v862_v55 }
 0x368   : > { %v522_v0 = vsel %vm494_vm2, %v516_v62, -inf }
 0x369   : > { %523 = vmax.xlane.f32.xlu1 %v522_v0  ;;  %v519_v1 = vsel %vm494_vm2, %v515_v63, -inf }
 0x36a   : > { %520 = vmax.xlane.f32.xlu0 %v519_v1 }
 0x3f6   : > { %v524_v4 = vpop.xlane.xlu1 %523 }
 0x3f7   : > { %vm526_vm3 = vcmp.eq.f32.partialorder %v516_v62, %v524_v4  ;;  %v521_v5 = vpop.xlane.xlu0 %520  ;;  %v561_v39 = vsel %vm559_vm9, %v524_v4, 0.0 }
 0x3f8   : > { %v528_v6 = vsel %vm526_vm3, %v1077_v3, 4  ;;  %vm525_vm4 = vcmp.eq.f32.partialorder %v515_v63, %v521_v5  ;;  %v560_v37 = vsel %vm559_vm9, %v521_v5, 0.0 }
 0x3f9   : > { %v527_v7 = vsel %vm525_vm4, %v1077_v3, 4  ;;  %v544_v8 = vsel %vm494_vm2, %v528_v6, 2147483647 }
 0x3fa   : > { %v546_v9 = vshra.s32 %v544_v8, 16  ;;  %v529_v10 = vsel %vm494_vm2, %v527_v7, 2147483647  ;;  %v545_v14 = vand.u32 65535, %v544_v8 }
 0x3fb   : > { %v531_v11 = vshra.s32 %v529_v10, 16  ;;  %v530_v15 = vand.u32 65535, %v529_v10 }
 0x3fc   : > { %v548_v12 = vcvt.s32.f32 %v546_v9  ;;  %v547_v17 = vcvt.s32.f32 %v545_v14 }
 0x3fd   : > { %v533_v13 = vcvt.s32.f32 %v531_v11  ;;  %v532_v19 = vcvt.s32.f32 %v530_v15 }
 0x3fe   : > { %549 = vmin.xlane.f32.xlu1 %v548_v12 }
 0x3ff   : > { %534 = vmin.xlane.f32.xlu0 %v533_v13 }
 0x48b   : > { %v550_v16 = vpop.xlane.xlu1 %549 }
 0x48c   : > { %v535_v18 = vpop.xlane.xlu0 %534  ;;  %vm551_vm5 = vcmp.eq.f32.partialorder %v548_v12, %v550_v16  ;;  %v556_v22 = vcvt.f32.s32 %v550_v16 }
 0x48d   : > { %v552_v20 = vsel %vm551_vm5, %v547_v17, inf  ;;  %vm536_vm6 = vcmp.eq.f32.partialorder %v533_v13, %v535_v18  ;;  %v541_v23 = vcvt.f32.s32 %v535_v18 }
 0x48e   : > { %553 = vmin.xlane.f32.xlu1 %v552_v20  ;;  %v537_v21 = vsel %vm536_vm6, %v532_v19, inf  ;;  %v557_v25 = vshll.u32 %v556_v22, 16 }
 0x48f   : > { %538 = vmin.xlane.f32.xlu0 %v537_v21  ;;  %v542_v28 = vshll.u32 %v541_v23, 16 }
 0x51b   : > { %v554_v24 = vpop.xlane.xlu1 %553 }
 0x51c   : > { %v555_v26 = vcvt.f32.s32 %v554_v24  ;;  %v539_v27 = vpop.xlane.xlu0 %538 }
 0x51d   : > { %v540_v29 = vcvt.f32.s32 %v539_v27 }
 0x51e   : > { %v1083_v30 = vadd.s32 %v557_v25, %v555_v26 }
 0x51f   : > { %v1085_v31 = vadd.s32 %v542_v28, %v540_v29 }
 0x520   : > { %vm565_vm7 = vcmp.eq.s32.totalorder %v1077_v3, %v1083_v30 }
 0x521   : > { %v567_v32 = vsel %vm565_vm7, -1.0, %v516_v62  ;;  %vm564_vm8 = vcmp.eq.s32.totalorder %v1077_v3, %v1085_v31 }
 0x522   : > { %v571_v33 = vsel %vm494_vm2, %v567_v32, -inf  ;;  %v566_v34 = vsel %vm564_vm8, -1.0, %v515_v63 }
 0x523   : > { %572 = vmax.xlane.f32.xlu1 %v571_v33  ;;  %v568_v35 = vsel %vm494_vm2, %v566_v34, -inf }
 0x524   : > { %569 = vmax.xlane.f32.xlu0 %v568_v35 }
 0x5b0   : > { %v573_v36 = vpop.xlane.xlu1 %572 }
 0x5b1   : > { %vm575_vm12 = vcmp.eq.f32.partialorder %v567_v32, %v573_v36  ;;  %v570_v38 = vpop.xlane.xlu0 %569  ;;  %v610_v42 = vsel %vm608_vm10, %v573_v36, %v561_v39 }
 0x5b2   : > { %v577_v40 = vsel %vm575_vm12, %v1077_v3, 4  ;;  %vm574_vm13 = vcmp.eq.f32.partialorder %v566_v34, %v570_v38  ;;  %v609_v41 = vsel %vm608_vm10, %v570_v38, %v560_v37  ;;  %615 = vst.msk [vmem:[%s326_s19 + $0x8] sm:$0xff] %vm613_vm11, %v610_v42 }
 0x5b3   : > { %v576_v43 = vsel %vm574_vm13, %v1077_v3, 4  ;;  %614 = vst.msk [vmem:[%s326_s19] sm:$0xff] %vm613_vm11, %v609_v41  ;;  %v593_v44 = vsel %vm494_vm2, %v577_v40, 2147483647 }
 0x5b4   : > { %v595_v45 = vshra.s32 %v593_v44, 16  ;;  %v578_v46 = vsel %vm494_vm2, %v576_v43, 2147483647  ;;  %v594_v50 = vand.u32 65535, %v593_v44 }
 0x5b5   : > { %v580_v47 = vshra.s32 %v578_v46, 16  ;;  %v579_v51 = vand.u32 65535, %v578_v46 }
 0x5b6   : > { %v597_v48 = vcvt.s32.f32 %v595_v45  ;;  %v596_v53 = vcvt.s32.f32 %v594_v50 }
 0x5b7   : > { %v582_v49 = vcvt.s32.f32 %v580_v47  ;;  %v581_v55 = vcvt.s32.f32 %v579_v51 }
 0x5b8   : > { %598 = vmin.xlane.f32.xlu1 %v597_v48 }
 0x5b9   : > { %583 = vmin.xlane.f32.xlu0 %v582_v49 }
 0x645   : > { %v599_v52 = vpop.xlane.xlu1 %598 }
 0x646   : > { %v584_v54 = vpop.xlane.xlu0 %583  ;;  %vm600_vm14 = vcmp.eq.f32.partialorder %v597_v48, %v599_v52 }
 0x647   : > { %v601_v56 = vsel %vm600_vm14, %v596_v53, inf  ;;  %vm585_vm15 = vcmp.eq.f32.partialorder %v582_v49, %v584_v54 }
 0x648   : > { %602 = vmin.xlane.f32.xlu1 %v601_v56  ;;  %v586_v57 = vsel %vm585_vm15, %v581_v55, inf }
 0x649   : > { %587 = vmin.xlane.f32.xlu0 %v586_v57 }
 0x64a   : > { %880 = shalt.err (!%p877_p3)
}
 0x64b   : > { %s881_s20 = scalar_lea.hbm %s1118_s25, 128  ;;  %s885_s21 = scalar_lea.hbm %s1187_s6, 256 }
 0x64c   : > { %p882_p4 = scmp.ne.s32.totalorder %s1118_s25, %s881_s20  ;;  %p886_p9 = scmp.lt.u32.totalorder %s1118_s25, %s1187_s6 }
 0x64d   : > { %p887_p10 = scmp.lt.u32.totalorder %s885_s21, %s881_s20  ;;  %p889_p12 = scmp.lt.u32.totalorder %s881_s20, %s1118_s25 }
 0x64e   : > { %p883_p7 = pnand %p882_p4, %p1017_p5 }
 0x64f   : > { %p888_p11 = por %p887_p10, %p886_p9 }
 0x650   : > { %p884_p8 = pneg %p883_p7 }
 0x651   : > { %p890_p13 = por %p889_p12, %p888_p11 }
 0x653   : > { %p891_p0 = pnand %p890_p13, %p884_p8 }
 0x655   : > { %894 = shalt.err (!%p891_p0)
}
 0x656   : > { %s932_s12 = smov 64   ;;  %s933_s9 = smov 4   ;;  %v605_v58 = vcvt.f32.s32 %v599_v52  ;;  %v590_v59 = vcvt.f32.s32 %v584_v54  ;;  %v562_v5 = vsel %vm559_vm9, %v1085_v31, 0  ;;  %v563_v6 = vsel %vm559_vm9, %v1083_v30, 0 }
 0x657   : > { %814 = dma.vmem_to_hbm [thread:$0]  (%p1017_p5), %s1120_s22, 128, %s1118_s25, %s1124_s10, %s932_s12, %s932_s12, %s933_s9  }
 0x658   : > { %v606_v61 = vshll.u32 %v605_v58, 16  ;;  %v591_v0 = vshll.u32 %v590_v59, 16  ;;  %s332_s20 = scalar_lea.vmem %s1189_s8, %s1028_s18 }
 0x6d5   : > { %v603_v60 = vpop.xlane.xlu1 %602 }
 0x6d6   : > { %v604_v62 = vcvt.f32.s32 %v603_v60  ;;  %v588_v63 = vpop.xlane.xlu0 %587 }
 0x6d7   : > { %v589_v1 = vcvt.f32.s32 %v588_v63 }
 0x6d8   : > { %v607_v2 = vadd.s32 %v606_v61, %v604_v62 }
 0x6d9   : > { %v592_v4 = vadd.s32 %v591_v0, %v589_v1 }
 0x6da   : > { %v612_v8 = vsel %vm608_vm10, %v607_v2, %v563_v6 }
 0x6db   : > { %v611_v7 = vsel %vm608_vm10, %v592_v4, %v562_v5  ;;  %617 = vst.msk [vmem:[%s332_s20 + $0x8] sm:$0xff] %vm613_vm11, %v612_v8 }
 0x6dc   : > { %616 = vst.msk [vmem:[%s332_s20] sm:$0xff] %vm613_vm11, %v611_v7 }
 0x6dd PF: > { %p820_p5 = scmp.ge.s32.totalorder %s929_s30, 2  ;;  %s665_s15 = sand.u32 1, %s917_s27  }
 0x6de   : > { %s666_s18 = scalar_lea.sflag [#allocation3], %s665_s15 }
 0x6df   : > { %p817_p1 = pnand %p820_p5, %p1021_p6 }
 0x6e1   : > { %912 = dma.done.wait (!%p817_p1), %s666_s18, 128  }
 0x6e2   : > { %914 = vsyncadd (!%p817_p1), %s666_s18, 4294967168  ;;  %p19_p2 = scmp.ge.s32.totalorder %s1004_s11, 4   ;;  %s1192_s27 = smov %s921_s28 }
 0x6e3   : > { %s1193_s28 = smov %s925_s29  ;;  %s1194_s29 = smov %s1015_s14 }
 0x6e4   : > { %s1195_s30 = smov %s1004_s11  ;;  %21 = sbr.rel (!%p19_p2) target bundleno = 3 (0x3), region = 103 }
 0x6eb   :  { %687 = vsyncpa [#allocation3], 1 }
 0x6ec   :  { %689 = vsyncpa [#allocation3 + $0x1], 1 }

</bundles_post_ra>
